<compile_context>
chip_gen: v7x
topology: tpu7x:2x2x1
jax: 0.10.0
libtpu: 0.0.40
codegen_flags: <defaults>
</compile_context>

<pallas_src>
import functools

import jax
import jax.numpy as jnp
from jax import lax
from jax.experimental import pallas as pl
from jax.experimental.pallas import tpu as pltpu


def _attention_kernel(x_ref, w_ref, o_ref, *, B, S, H):
    # x_ref: (B*S, H) f32   — all batch rows, flattened
    # w_ref: (3, H, H) f32  — stacked [Wq^T, Wk^T, Wv^T] (pre-transposed host-side)
    # o_ref: (B, H)         — mean-pooled attention output (single store)
    x = x_ref[...]

    # Q/K/V projections: plain (B*S,H)@(H,H) MXU matmuls, no in-kernel transposes,
    # no unaligned lane slicing of a fused projection slab.
    q = jnp.dot(x, w_ref[0], preferred_element_type=jnp.float32)   # (B*S, H)
    k = jnp.dot(x, w_ref[1], preferred_element_type=jnp.float32)   # (B*S, H)
    v = jnp.dot(x, w_ref[2], preferred_element_type=jnp.float32)   # (B*S, H)

    inv_s = jnp.float32(1.0 / S)
    rows = []
    for b in range(B):                       # static unroll; B is tiny
        lo = b * S                           # sublane-aligned slices (S == 8)
        q_b = q[lo:lo + S, :]                # (S, H)
        k_b = k[lo:lo + S, :]                # (S, H)
        v_b = v[lo:lo + S, :]                # (S, H)

        # scores = Q @ K^T with the transpose folded into the contraction.
        scores = lax.dot_general(
            q_b, k_b,
            dimension_numbers=(((1,), (1,)), ((), ())),
            preferred_element_type=jnp.float32)                    # (S, S)

        # Numerically-stable softmax along the last dim.
        m = jnp.max(scores, axis=-1, keepdims=True)                # (S, 1)
        e = jnp.exp(scores - m)                                    # (S, S)
        denom = jnp.sum(e, axis=-1, keepdims=True)                 # (S, 1)
        r = pl.reciprocal(denom, approx=False)                     # exact: holds 1e-5 tol

        # mean_q(alpha @ V) == ((1/S) * colsum(alpha)) @ V  -> one (1,S)@(S,H) matvec.
        w_pool = jnp.sum(e * r, axis=0, keepdims=True) * inv_s     # (1, S)
        rows.append(jnp.dot(w_pool, v_b,
                            preferred_element_type=jnp.float32))   # (1, H)

    # One lane-dense store of the whole batch output.
    o_ref[...] = jnp.concatenate(rows, axis=0).astype(o_ref.dtype)  # (B, H)


def attention_layer(x, wq, wk, wv):
    """x: (B, S, H) f32; wq/wk/wv: (H, H) f32 in nn.Linear (out, in) layout."""
    B, S, H = x.shape

    # Host-side one-time weight prep: transpose to (in, out) and stack -> one DMA.
    wqkv = jnp.stack([wq.T, wk.T, wv.T], axis=0)        # (3, H, H)
    x2d = x.reshape(B * S, H)                            # flatten batch for projection

    kernel = functools.partial(_attention_kernel, B=B, S=S, H=H)

    # Grid fully collapsed: optimal on v5e/v6e (1 TC) at these tiny shapes; on v7x
    # a batch split across 2 cores would only add fixed per-step cost here.
    return pl.pallas_call(
        kernel,
        out_shape=jax.ShapeDtypeStruct((B, H), x.dtype),
        grid_spec=pltpu.PrefetchScalarGridSpec(
            num_scalar_prefetch=0,
            grid=(1,),
            in_specs=[
                pl.BlockSpec((B * S, H), lambda i: (0, 0)),
                pl.BlockSpec((3, H, H), lambda i: (0, 0, 0)),
            ],
            out_specs=pl.BlockSpec((B, H), lambda i: (0, 0)),
        ),
        compiler_params=pltpu.CompilerParams(
            dimension_semantics=("arbitrary",),
        ),
    )(x2d, wqkv)


def _reference(x, wq, wk, wv):
    q = jnp.einsum("bsh,oh->bso", x, wq)
    k = jnp.einsum("bsh,oh->bso", x, wk)
    v = jnp.einsum("bsh,oh->bso", x, wv)
    scores = jnp.einsum("bso,bto->bst", q, k)
    alpha = jax.nn.softmax(scores, axis=-1)
    out = jnp.einsum("bst,bth->bsh", alpha, v)
    return jnp.mean(out, axis=-2)


if __name__ == "__main__":
    B, S, H = 2, 8, 32  # batch, sequence, hidden_dim

    key = jax.random.PRNGKey(0)
    kx, kq, kk, kv = jax.random.split(key, 4)

    x = jax.random.normal(kx, (B, S, H), dtype=jnp.float32)
    # Deterministic "Kaiming-uniform-like" init consistent with nn.Linear (H, H).
    bound = 1.0 / jnp.sqrt(H)
    wq = jax.random.uniform(kq, (H, H), jnp.float32, -bound, bound)
    wk = jax.random.uniform(kk, (H, H), jnp.float32, -bound, bound)
    wv = jax.random.uniform(kv, (H, H), jnp.float32, -bound, bound)

    out = jax.block_until_ready(attention_layer(x, wq, wk, wv))

    ref = _reference(x, wq, wk, wv)
    assert out.shape == (B, H), out.shape
    assert jnp.allclose(out, ref, atol=1e-5, rtol=1e-5), \
        float(jnp.max(jnp.abs(out - ref)))

    print("KERNEL_OK")
</pallas_src>

<mosaic_0001>
module attributes {stable_mosaic.version = 11 : i64} {
  func.func @_attention_kernel(%arg0: i32, %arg1: memref<16x32xf32, #tpu.memory_space<vmem>>, %arg2: memref<3x32x32xf32, #tpu.memory_space<vmem>>, %arg3: memref<2x32xf32, #tpu.memory_space<vmem>>) attributes {dimension_semantics = [#tpu.dimension_semantics<arbitrary>], iteration_bounds = array<i64: 1>, scalar_prefetch = 0 : i64, scratch_operands = 0 : i64, tpu.core_type = #tpu.core_type<tc>, window_params = [{pipeline_mode = #tpu.pipeline_mode<synchronous>, transform_indices = @transform_0, window_bounds = array<i64: 16, 32>}, {pipeline_mode = #tpu.pipeline_mode<synchronous>, transform_indices = @transform_1, window_bounds = array<i64: 3, 32, 32>}, {pipeline_mode = #tpu.pipeline_mode<synchronous>, transform_indices = @transform_2, window_bounds = array<i64: 2, 32>}]} {
    %c0 = arith.constant 0 : index
    %c0_0 = arith.constant 0 : index
    %0 = vector.load %arg1[%c0, %c0_0] : memref<16x32xf32, #tpu.memory_space<vmem>>, vector<16x32xf32>
    %c0_1 = arith.constant 0 : index
    %c0_2 = arith.constant 0 : index
    %c0_3 = arith.constant 0 : index
    %1 = vector.load %arg2[%c0_1, %c0_2, %c0_3] : memref<3x32x32xf32, #tpu.memory_space<vmem>>, vector<1x32x32xf32>
    %2 = vector.shape_cast %1 : vector<1x32x32xf32> to vector<32x32xf32>
    %cst = arith.constant dense<0.000000e+00> : vector<16x32xf32>
    %3 = tpu.matmul %0, %2, %cst {dimension_numbers = #tpu.dot_dimension_numbers<[1], [0], [0], [1], [0, 0, 1, 1], [], []>} : vector<16x32xf32>, vector<32x32xf32>, vector<16x32xf32> -> vector<16x32xf32>
    %c1 = arith.constant 1 : index
    %c0_4 = arith.constant 0 : index
    %c0_5 = arith.constant 0 : index
    %4 = vector.load %arg2[%c1, %c0_4, %c0_5] : memref<3x32x32xf32, #tpu.memory_space<vmem>>, vector<1x32x32xf32>
    %5 = vector.shape_cast %4 : vector<1x32x32xf32> to vector<32x32xf32>
    %cst_6 = arith.constant dense<0.000000e+00> : vector<16x32xf32>
    %6 = tpu.matmul %0, %5, %cst_6 {dimension_numbers = #tpu.dot_dimension_numbers<[1], [0], [0], [1], [0, 0, 1, 1], [], []>} : vector<16x32xf32>, vector<32x32xf32>, vector<16x32xf32> -> vector<16x32xf32>
    %c2 = arith.constant 2 : index
    %c0_7 = arith.constant 0 : index
    %c0_8 = arith.constant 0 : index
    %7 = vector.load %arg2[%c2, %c0_7, %c0_8] : memref<3x32x32xf32, #tpu.memory_space<vmem>>, vector<1x32x32xf32>
    %8 = vector.shape_cast %7 : vector<1x32x32xf32> to vector<32x32xf32>
    %cst_9 = arith.constant dense<0.000000e+00> : vector<16x32xf32>
    %9 = tpu.matmul %0, %8, %cst_9 {dimension_numbers = #tpu.dot_dimension_numbers<[1], [0], [0], [1], [0, 0, 1, 1], [], []>} : vector<16x32xf32>, vector<32x32xf32>, vector<16x32xf32> -> vector<16x32xf32>
    %10 = vector.extract_strided_slice %3 {offsets = [0, 0], sizes = [8, 32], strides = [1, 1]} : vector<16x32xf32> to vector<8x32xf32>
    %11 = vector.extract_strided_slice %6 {offsets = [0, 0], sizes = [8, 32], strides = [1, 1]} : vector<16x32xf32> to vector<8x32xf32>
    %12 = vector.extract_strided_slice %9 {offsets = [0, 0], sizes = [8, 32], strides = [1, 1]} : vector<16x32xf32> to vector<8x32xf32>
    %cst_10 = arith.constant dense<0.000000e+00> : vector<8x8xf32>
    %13 = tpu.matmul %10, %11, %cst_10 {dimension_numbers = #tpu.dot_dimension_numbers<[1], [1], [0], [0], [0, 0, 1, 0], [], []>} : vector<8x32xf32>, vector<8x32xf32>, vector<8x8xf32> -> vector<8x8xf32>
    %cst_11 = arith.constant dense<0xFF800000> : vector<8xf32>
    %14 = vector.multi_reduction <maximumf>, %13, %cst_11 [1] : vector<8x8xf32> to vector<8xf32>
    %15 = vector.shape_cast %14 : vector<8xf32> to vector<8x1xf32>
    %16 = vector.broadcast %15 : vector<8x1xf32> to vector<8x8xf32>
    %17 = arith.subf %13, %16 : vector<8x8xf32>
    %18 = math.exp %17 : vector<8x8xf32>
    %cst_12 = arith.constant dense<0.000000e+00> : vector<8xf32>
    %19 = vector.multi_reduction <add>, %18, %cst_12 [1] : vector<8x8xf32> to vector<8xf32>
    %20 = vector.shape_cast %19 : vector<8xf32> to vector<8x1xf32>
    %21 = tpu.reciprocal %20 : vector<8x1xf32> -> vector<8x1xf32>
    %22 = vector.broadcast %21 : vector<8x1xf32> to vector<8x8xf32>
    %23 = arith.mulf %18, %22 : vector<8x8xf32>
    %cst_13 = arith.constant dense<0.000000e+00> : vector<8xf32>
    %24 = vector.multi_reduction <add>, %23, %cst_13 [0] : vector<8x8xf32> to vector<8xf32>
    %25 = vector.shape_cast %24 : vector<8xf32> to vector<1x8xf32>
    %cst_14 = arith.constant 1.250000e-01 : f32
    %26 = vector.broadcast %cst_14 : f32 to vector<1x8xf32>
    %27 = arith.mulf %25, %26 : vector<1x8xf32>
    %cst_15 = arith.constant dense<0.000000e+00> : vector<1x32xf32>
    %28 = tpu.matmul %27, %12, %cst_15 {dimension_numbers = #tpu.dot_dimension_numbers<[1], [0], [0], [1], [0, 0, 1, 1], [], []>} : vector<1x8xf32>, vector<8x32xf32>, vector<1x32xf32> -> vector<1x32xf32>
    %29 = vector.extract_strided_slice %3 {offsets = [8, 0], sizes = [8, 32], strides = [1, 1]} : vector<16x32xf32> to vector<8x32xf32>
    %30 = vector.extract_strided_slice %6 {offsets = [8, 0], sizes = [8, 32], strides = [1, 1]} : vector<16x32xf32> to vector<8x32xf32>
    %31 = vector.extract_strided_slice %9 {offsets = [8, 0], sizes = [8, 32], strides = [1, 1]} : vector<16x32xf32> to vector<8x32xf32>
    %cst_16 = arith.constant dense<0.000000e+00> : vector<8x8xf32>
    %32 = tpu.matmul %29, %30, %cst_16 {dimension_numbers = #tpu.dot_dimension_numbers<[1], [1], [0], [0], [0, 0, 1, 0], [], []>} : vector<8x32xf32>, vector<8x32xf32>, vector<8x8xf32> -> vector<8x8xf32>
    %cst_17 = arith.constant dense<0xFF800000> : vector<8xf32>
    %33 = vector.multi_reduction <maximumf>, %32, %cst_17 [1] : vector<8x8xf32> to vector<8xf32>
    %34 = vector.shape_cast %33 : vector<8xf32> to vector<8x1xf32>
    %35 = vector.broadcast %34 : vector<8x1xf32> to vector<8x8xf32>
    %36 = arith.subf %32, %35 : vector<8x8xf32>
    %37 = math.exp %36 : vector<8x8xf32>
    %cst_18 = arith.constant dense<0.000000e+00> : vector<8xf32>
    %38 = vector.multi_reduction <add>, %37, %cst_18 [1] : vector<8x8xf32> to vector<8xf32>
    %39 = vector.shape_cast %38 : vector<8xf32> to vector<8x1xf32>
    %40 = tpu.reciprocal %39 : vector<8x1xf32> -> vector<8x1xf32>
    %41 = vector.broadcast %40 : vector<8x1xf32> to vector<8x8xf32>
    %42 = arith.mulf %37, %41 : vector<8x8xf32>
    %cst_19 = arith.constant dense<0.000000e+00> : vector<8xf32>
    %43 = vector.multi_reduction <add>, %42, %cst_19 [0] : vector<8x8xf32> to vector<8xf32>
    %44 = vector.shape_cast %43 : vector<8xf32> to vector<1x8xf32>
    %cst_20 = arith.constant 1.250000e-01 : f32
    %45 = vector.broadcast %cst_20 : f32 to vector<1x8xf32>
    %46 = arith.mulf %44, %45 : vector<1x8xf32>
    %cst_21 = arith.constant dense<0.000000e+00> : vector<1x32xf32>
    %47 = tpu.matmul %46, %31, %cst_21 {dimension_numbers = #tpu.dot_dimension_numbers<[1], [0], [0], [1], [0, 0, 1, 1], [], []>} : vector<1x8xf32>, vector<8x32xf32>, vector<1x32xf32> -> vector<1x32xf32>
    %48 = tpu.concatenate %28, %47 in 0 : vector<1x32xf32>, vector<1x32xf32> -> vector<2x32xf32>
    %c0_22 = arith.constant 0 : index
    %c0_23 = arith.constant 0 : index
    %49 = vector.load %arg3[%c0_22, %c0_23] : memref<2x32xf32, #tpu.memory_space<vmem>>, vector<2x32xf32>
    tpu.vector_store %arg3[%c0_22, %c0_23], %48 {strides = array<i32>} : memref<2x32xf32, #tpu.memory_space<vmem>>, vector<2x32xf32>,
    return
  }
  func.func @transform_0(%arg0: i32) -> (i32, i32) {
    %c0_i32 = arith.constant 0 : i32
    %c0_i32_0 = arith.constant 0 : i32
    %c0_i32_1 = arith.constant 0 : i32
    return %c0_i32, %c0_i32_0 : i32, i32
  }
  func.func @transform_1(%arg0: i32) -> (i32, i32, i32) {
    %c0_i32 = arith.constant 0 : i32
    %c0_i32_0 = arith.constant 0 : i32
    %c0_i32_1 = arith.constant 0 : i32
    %c0_i32_2 = arith.constant 0 : i32
    return %c0_i32, %c0_i32_0, %c0_i32_1 : i32, i32, i32
  }
  func.func @transform_2(%arg0: i32) -> (i32, i32) {
    %c0_i32 = arith.constant 0 : i32
    %c0_i32_0 = arith.constant 0 : i32
    %c0_i32_1 = arith.constant 0 : i32
    return %c0_i32, %c0_i32_0 : i32, i32
  }
}

</mosaic_0001>

<bundles_post_ra>
// kernel: tpu_custom_call.1
= control target key start
LH: loop header
LB: loop body
LE: loop exit
PB: predicated region body
PF: predicated region fallthrough
CT: control target
= control target key end

     0   :  { %7 = vsyncpa [#allocation3], 0  ;;  %s938_s0 = inlined_call_operand.hbm [shape: f32[16,32], index: 0, kind: input, shape index: {}]   ;;  %s939_s1 = inlined_call_operand.hbm [shape: f32[3,32,32], index: 1, kind: input, shape index: {}]   ;;  %s940_s2 = inlined_call_operand.hbm [shape: f32[2,32], index: 2, kind: output, shape index: {}]  }
   0x1   :  { %8 = vsyncpa [#allocation6], 0 }
   0x2   :  { %9 = vsyncpa [#allocation4], 0  ;;  %s850_s9 = smov [#allocation2]   ;;  %s778_s13 = scalar_lea.hbm %s938_s0, 256 }
   0x3   :  { %s15_s10 = sshll.u32 %s850_s9, 4  ;;  %p779_p0 = scmp.ne.s32.totalorder %s938_s0, %s778_s13  ;;  %s16_s10 = int_to_ptr.vmem [resolvable:$true] %s15_s10 }
   0x4   :  { %p782_p1 = scmp.lt.u32.totalorder %s778_s13, %s938_s0 }
   0x6   :  { %p784_p2 = pnand %p782_p1, %p779_p0 }
   0x8   :  { %787 = shalt.err (!%p784_p2)
}
   0x9   :  { %s788_s18 = scalar_lea.vmem %s16_s10, 256  ;;  %p793_p4 = scmp.lt.s32.totalorder %s16_s10, %s16_s10 }
   0xa   :  { %p789_p3 = scmp.ne.s32.totalorder %s16_s10, %s788_s18  ;;  %p794_p5 = scmp.lt.s32.totalorder %s788_s18, %s788_s18 }
   0xc   :  { %p795_p6 = por %p794_p5, %p793_p4 }
   0xe   :  { %p796_p7 = pnand %p795_p6, %p789_p3 }
  0x10   :  { %799 = shalt.err (!%p796_p7)
}
  0x11   :  { %s851_s19 = smov 128   ;;  %s852_s20 = smov 8  }
  0x12   :  { %21 = dma.hbm_to_vmem [thread:$0]  %s938_s0, 256, %s16_s10, [#allocation3], %s851_s19, %s851_s19, %s852_s20  }
  0x13   :  { %s853_s23 = smov [#allocation5]   ;;  %s800_s27 = scalar_lea.hbm %s939_s1, 1536 }
  0x14   :  { %s27_s24 = sshll.u32 %s853_s23, 4  ;;  %p801_p8 = scmp.ne.s32.totalorder %s939_s1, %s800_s27  ;;  %s28_s24 = int_to_ptr.vmem [resolvable:$true] %s27_s24 }
  0x15   :  { %p804_p9 = scmp.lt.u32.totalorder %s800_s27, %s939_s1 }
  0x17   :  { %p806_p10 = pnand %p804_p9, %p801_p8 }
  0x19   :  { %809 = shalt.err (!%p806_p10)
}
  0x1a   :  { %s810_s4 = scalar_lea.vmem %s28_s24, 1536  ;;  %p815_p12 = scmp.lt.s32.totalorder %s28_s24, %s28_s24 }
  0x1b   :  { %p811_p11 = scmp.ne.s32.totalorder %s28_s24, %s810_s4  ;;  %p816_p13 = scmp.lt.s32.totalorder %s810_s4, %s810_s4 }
  0x1d   :  { %p817_p0 = por %p816_p13, %p815_p12 }
  0x1f   :  { %p818_p1 = pnand %p817_p0, %p811_p11 }
  0x21   :  { %821 = shalt.err (!%p818_p1)
}
  0x22   :  { %33 = dma.hbm_to_vmem [thread:$0]  %s939_s1, 1536, %s28_s24, [#allocation6], %s851_s19, %s851_s19, %s852_s20  }
  0x23   :  { %844 = dma.done.wait [#allocation3], 256  }
  0x24   :  { %845 = vsyncadd [#allocation3], 4294967040 }
  0x25   :  { %846 = dma.done.wait [#allocation6], 1536  }
  0x26   :  { %847 = vsyncadd [#allocation6], 4294965760  ;;  %v129_v0 = vld [vmem:[#allocation5 + $0x20] sm:$0xff]  ;;  %v130_v1 = vld [vmem:[#allocation5 + $0x28] sm:$0xff]  ;;  %vm46_vm0 = vcmask 261120   ;;  %v854_v20 = vmov 0.0  }
  0x27   :  { %v42_v2 = vld [vmem:[#allocation5] sm:$0xff]  ;;  %v747_v3 = vpack.c.bf16 %v130_v1, %v129_v0  ;;  %v43_v4 = vld [vmem:[#allocation5 + $0x8] sm:$0xff]  ;;  %v131_v5 = vld [vmem:[#allocation5 + $0x30] sm:$0xff]  ;;  %vm855_vm1 = vmmov 0   ;;  %vm364_vm2 = vcmask 64512   ;;  %s856_s1 = smov [#allocation7]  }
  0x28   :  { %v132_v6 = vld [vmem:[#allocation5 + $0x38] sm:$0xff]  ;;  %v739_v7 = vpack.c.bf16 %v43_v4, %v42_v2  ;;  %v44_v9 = vld [vmem:[#allocation5 + $0x10] sm:$0xff]  ;;  %v209_v13 = vld [vmem:[#allocation5 + $0x40] sm:$0xff]  ;;  %s638_s6 = sshll.u32 %s856_s1, 4  ;;  %vm628_vm3 = vcmask 1040384   ;;  %vm630_vm4 = vcmask 254976   ;;  %s639_s6 = int_to_ptr.vmem [resolvable:$true] %s638_s6 }
  0x29   :  { %v751_v8 = vpack.c.bf16 %v132_v6, %v131_v5  ;;  %v45_v10 = vld [vmem:[#allocation5 + $0x18] sm:$0xff]  ;;  %v40_v11 = vld [vmem:[#allocation2] sm:$0xff]  ;;  %748 = vmatprep.subr.bf16.mxu1 %v747_v3  ;;  %v210_v14 = vld [vmem:[#allocation5 + $0x48] sm:$0xff]  ;;  %s822_s7 = scalar_lea.vmem %s639_s6, 32  ;;  %p827_p3 = scmp.lt.s32.totalorder %s639_s6, %s639_s6 }
  0x2a   :  { %v743_v12 = vpack.c.bf16 %v45_v10, %v44_v9  ;;  %705 = vmatprep.mubr.msk.f32.mxu1 %vm46_vm0, %v40_v11  ;;  %750 = vmatpush3.bf16.msra.mxu1 %v747_v3  ;;  %v755_v15 = vpack.c.bf16 %v210_v14, %v209_v13  ;;  %v211_v16 = vld [vmem:[#allocation5 + $0x50] sm:$0xff]  ;;  %v212_v17 = vld [vmem:[#allocation5 + $0x58] sm:$0xff]  ;;  %p823_p2 = scmp.ne.s32.totalorder %s639_s6, %s822_s7  ;;  %p828_p4 = scmp.lt.s32.totalorder %s822_s7, %s822_s7 }
  0x2b   :  { %740 = vmatprep.subr.bf16.mxu0 %v739_v7  ;;  %752 = vmatprep.subr.bf16.mxu1 %v751_v8  ;;  %v41_v18 = vld [vmem:[#allocation2 + $0x8] sm:$0xff]  ;;  %v759_v19 = vpack.c.bf16 %v212_v17, %v211_v16 }
  0x2c   :  { %742 = vmatpush3.bf16.msra.mxu0 %v739_v7  ;;  %694 = vmatprep.mubr.msk.f32.mxu0 %vm46_vm0, %v40_v11  ;;  %p829_p5 = por %p828_p4, %p827_p3 }
  0x2d   :  { %744 = vmatprep.subr.bf16.mxu0 %v743_v12 }
  0x2e   :  { %754 = vmatpush3.bf16.msra.mxu1 %v751_v8  ;;  %p830_p6 = pnand %p829_p5, %p823_p2 }
  0x2f   :  { %719 = vmatprep.subr.mxu1 %v854_v20 }
  0x30   :  { %746 = vmatpush3.bf16.msra.mxu0 %v743_v12 }
  0x31   :  { %756 = vmatprep.subr.bf16.mxu0 %v755_v15  ;;  %706 = vmatmul.mubr.msk.f32.vlgmr.msra.gmra.mrb[0].mxu1 %vm46_vm0, %v41_v18 }
  0x32   :  { %721 = vmatprep.mubr.msk.f32.mxu1 %vm855_vm1, %v854_v20 }
  0x33   :  { %695 = vmatmul.mubr.msk.f32.vlgmr.msra.gmra.mrb[0].mxu0 %vm46_vm0, %v41_v18 }
  0x34   :  { %758 = vmatpush3.bf16.msra.mxu0 %v755_v15  ;;  %716 = vmatprep.mubr.msk.f32.mxu0 %vm46_vm0, %v40_v11 }
  0x35   :  { %760 = vmatprep.subr.bf16.mxu0 %v759_v19 }
  0x38   :  { %762 = vmatpush3.bf16.msra.mxu0 %v759_v19 }
  0x39   :  { %729 = vmatprep.subr.mxu0 %v854_v20 }
  0x3b   :  { %717 = vmatmul.mubr.msk.f32.vlgmr.msra.gmra.mrb[2].mxu0 %vm46_vm0, %v41_v18 }
  0x3c   :  { %731 = vmatprep.mubr.msk.f32.mxu0 %vm855_vm1, %v854_v20 }
 0x104   :  { %v707_v21 = vpop.f32.mrb[0].mxu1 }
 0x105   :  { %v199_v22 = vpop.f32.mrb[1].mxu1  ;;  %730 = vmatpush3.xpose.msk.msra.mxu0 %vm46_vm0, %v707_v21 }
 0x106   :  { %v696_v23 = vpop.f32.mrb[0].mxu0  ;;  %720 = vmatpush3.xpose.msk.msra.mxu1 %vm46_vm0, %v199_v22 }
 0x107   :  { %v119_v24 = vpop.f32.mrb[1].mxu0  ;;  %724 = vmatprep.subr.mxu1 %v854_v20 }
 0x108   :  { %732 = vmatmul.mubr.msk.f32.vlgmr.msra.gmra.mrb[4].mxu0 %vm46_vm0, %v696_v23 }
 0x109   :  { %722 = vmatmul.mubr.msk.f32.vlgmr.msra.gmra.mrb[2].mxu1 %vm46_vm0, %v119_v24 }
 0x10a   :  { %726 = vmatprep.mubr.msk.f32.mxu1 %vm855_vm1, %v854_v20 }
 0x10e   :  { %v718_v25 = vpop.f32.mrb[2].mxu0 }
 0x10f   :  { %v279_v26 = vpop.f32.mrb[3].mxu0 }
 0x110   :  { %725 = vmatpush3.msra.mxu1 %v279_v26 }
 0x111   :  { %734 = vmatprep.subr.mxu1 %v854_v20 }
 0x1db   :  { %v529_v27 = vpop.f32.mrb[4].mxu0 }
 0x1dc   :  { %v360_v28 = vpop.f32.mrb[2].mxu1  ;;  %v733_v29 = vpop.f32.mrb[5].mxu0  ;;  %v533_v32 = vsel %vm364_vm2, %v529_v27, -inf }
 0x1dd   :  { %v723_v30 = vpop.f32.mrb[3].mxu1  ;;  %v365_v31 = vsel %vm364_vm2, %v360_v28, -inf }
 0x1de   :  { %366 = vmax.xlane.f32.xlu0 %v365_v31 }
 0x1e2   :  { %534 = vmax.xlane.f32.xlu0 %v533_v32 }
 0x26b   :  { %v367_v33 = vpop.xlane.xlu0 %366 }
 0x26c   :  { %v368_v34 = vsub.f32 %v360_v28, %v367_v33 }
 0x26e   :  { %v369_v35 = vmul.f32 1.442695, %v368_v34 }
 0x26f   :  { %v535_v36 = vpop.xlane.xlu0 %534 }
 0x270   :  { %770 = vpow2.f32 %v369_v35  ;;  %v536_v37 = vsub.f32 %v529_v27, %v535_v36 }
 0x272   :  { %v537_v38 = vmul.f32 1.442695, %v536_v37 }
 0x274   :  { %772 = vpow2.f32 %v537_v38 }
 0x27a   :  { %v771_v39 = vpop.eup %770 }
 0x27b   :  { %v371_v40 = vsel %vm364_vm2, %v771_v39, 0.0 }
 0x27c   :  { %372 = vadd.xlane.f32.xlu1 %v371_v40 }
 0x27e   :  { %v773_v41 = vpop.eup %772 }
 0x27f   :  { %v539_v42 = vsel %vm364_vm2, %v773_v41, 0.0 }
 0x280   :  { %540 = vadd.xlane.f32.xlu1 %v539_v42 }
 0x309   :  { %v373_v43 = vpop.xlane.xlu1 %372 }
 0x30a   :  { %774 = vrcp.f32 %v373_v43 }
 0x30d   :  { %v541_v44 = vpop.xlane.xlu1 %540 }
 0x30e   :  { %776 = vrcp.f32 %v541_v44 }
 0x314   :  { %v775_v45 = vpop.eup %774 }
 0x315   :  { %v375_v46 = vmul.f32 %v775_v45, %v771_v39 }
 0x317   :  { %v376_v47 = vsel %vm364_vm2, %v375_v46, 0.0 }
 0x318   :  { %v777_v48 = vpop.eup %776  ;;  %v377_v49 = vrot.slane %v376_v47, 4 }
 0x319   :  { %v543_v50 = vmul.f32 %v777_v48, %v773_v41 }
 0x31a   :  { %v378_v51 = vadd.f32 %v377_v49, %v376_v47 }
 0x31b   :  { %v544_v52 = vsel %vm364_vm2, %v543_v50, 0.0 }
 0x31c   :  { %v545_v53 = vrot.slane %v544_v52, 4  ;;  %v379_v54 = vrot.slane %v378_v51, 2 }
 0x31e   :  { %v546_v55 = vadd.f32 %v545_v53, %v544_v52  ;;  %v380_v56 = vadd.f32 %v379_v54, %v378_v51 }
 0x320   :  { %v547_v57 = vrot.slane %v546_v55, 2  ;;  %v381_v58 = vrot.slane %v380_v56, 1 }
 0x322   :  { %v382_v59 = vadd.f32 %v381_v58, %v380_v56  ;;  %v548_v60 = vadd.f32 %v547_v57, %v546_v55 }
 0x324   :  { %v383_v61 = vmul.f32 0.125, %v382_v59  ;;  %v549_v62 = vrot.slane %v548_v60, 1 }
 0x326   :  { %727 = vmatmul.mubr.msk.f32.vlgmr.msra.gmra.mrb[4].mxu1 %vm364_vm2, %v383_v61  ;;  %v550_v63 = vadd.f32 %v549_v62, %v548_v60 }
 0x327   :  { %735 = vmatpush3.msra.mxu1 %v718_v25  ;;  %736 = vmatprep.mubr.msk.f32.mxu1 %vm855_vm1, %v854_v20 }
 0x328   :  { %v551_v0 = vmul.f32 0.125, %v550_v63 }
 0x32a   :  { %737 = vmatmul.mubr.msk.f32.vlgmr.msra.gmra.mrb[6].mxu1 %vm364_vm2, %v551_v0 }
 0x3f9   :  { %v453_v1 = vpop.f32.mrb[4].mxu1 }
 0x3fa   :  { %v728_v2 = vpop.f32.mrb[5].mxu1 }
 0x3fd   :  { %v621_v3 = vpop.f32.mrb[6].mxu1 }
 0x3fe   :  { %v626_v4 = vrot.slane %v621_v3, 7  ;;  %v738_v5 = vpop.f32.mrb[7].mxu1 }
 0x400   :  { %v629_v6 = vsel %vm628_vm3, %v453_v1, %v626_v4 }
 0x401   :  { %631 = vst.msk [vmem:[#allocation7] sm:$0x3] %vm630_vm4, %v629_v6 }
 0x402   :  { %833 = shalt.err (!%p830_p6)
}
 0x403   :  { %s834_s10 = scalar_lea.hbm %s940_s2, 32 }
 0x404   :  { %p835_p7 = scmp.ne.s32.totalorder %s940_s2, %s834_s10  ;;  %p838_p8 = scmp.lt.u32.totalorder %s834_s10, %s940_s2 }
 0x406   :  { %p840_p9 = pnand %p838_p8, %p835_p7 }
 0x408   :  { %843 = shalt.err (!%p840_p9)
}
 0x409   :  { %641 = dma.vmem_to_hbm [thread:$0]  %s639_s6, 32, %s940_s2, [#allocation4]  }
 0x40a   :  { %848 = dma.done.wait [#allocation4], 32  }
 0x40b   :  { %849 = vsyncadd [#allocation4], 4294967264 }
 0x40c   :  { %645 = vsyncpa [#allocation3], 1 }
 0x40d   :  { %646 = vsyncpa [#allocation6], 1 }
 0x40e   :  { %647 = vsyncpa [#allocation4], 1 }

</bundles_post_ra>
